<compile_context>
chip_gen: v7x
topology: tpu7x:2x2x1
jax: 0.10.0
libtpu: 0.0.40
codegen_flags: <defaults>
</compile_context>

<pallas_src>
import jax
import jax.numpy as jnp
from jax.experimental import pallas as pl
from jax.experimental.pallas import tpu as pltpu

IN_FEATURES = 28 * 28      # 784
H1 = 128
H2 = 256
OUT_FEATURES = 10


def _round_up(v, m):
    return ((v + m - 1) // m) * m


def mlp_kernel(x_ref, w1_ref, b1_ref, w2_ref, b2_ref, w3_ref, b3_ref, o_ref):
    # x_ref: (tb, 784) f32 tile; weights bf16, biases f32, output (tb, 10) f32.
    # In-kernel cast to bf16 (hidden under the input DMA).
    x = x_ref[...].astype(jnp.bfloat16)

    # layer_1 + relu (f32 accumulation on the MXU, f32 elementwise)
    h1 = jnp.dot(x, w1_ref[...], preferred_element_type=jnp.float32)
    h1 = jnp.maximum(h1 + b1_ref[...], 0.0)                       # (tb, 128) f32

    # layer_2 + relu
    h2 = jnp.dot(h1.astype(jnp.bfloat16), w2_ref[...],
                 preferred_element_type=jnp.float32)
    h2 = jnp.maximum(h2 + b2_ref[...], 0.0)                       # (tb, 256) f32

    # layer_3 (true 10-wide logits; Mosaic masks the non-128 lane tail)
    logits = jnp.dot(h2.astype(jnp.bfloat16), w3_ref[...],
                     preferred_element_type=jnp.float32)
    logits = logits + b3_ref[...]                                 # (tb, 10) f32

    # Numerically stable log_softmax over dim=1.
    m = jnp.max(logits, axis=1, keepdims=True)
    shifted = logits - m
    lse = jnp.log(jnp.sum(jnp.exp(shifted), axis=1, keepdims=True))
    o_ref[...] = shifted - lse


def mnist_classifier_forward(x_nchw, params, *, block_batch=1024):
    """x_nchw: (B, C, H, W) with C*H*W == 784. Returns (B, 10) f32 log-probs."""
    w1, b1, w2, b2, w3, b3 = params
    batch = x_nchw.shape[0]

    # Flatten only -- no pad/cast pass over the dominant tensor.
    x_flat = x_nchw.reshape(batch, -1).astype(jnp.float32)        # (B, 784)

    # Batch tile: multiple of 16 (bf16 sublane pairs), capped at block_batch.
    # When the batch is large enough, force >=2 tiles so v7x megacore shards
    # the batch grid across both TensorCores.
    b_aligned = _round_up(batch, 16)
    tb = min(block_batch, b_aligned)
    if b_aligned >= 32:
        tb = min(tb, _round_up((b_aligned + 1) // 2, 16))
    n_tiles = (b_aligned + tb - 1) // tb
    b_pad = n_tiles * tb
    if b_pad != batch:
        x_flat = jnp.pad(x_flat, ((0, b_pad - batch), (0, 0)))

    def resident(shape):
        # Same block every grid step -> stays resident in VMEM.
        return pl.BlockSpec(shape, lambda i: (0, 0))

    out = pl.pallas_call(
        mlp_kernel,
        out_shape=jax.ShapeDtypeStruct((b_pad, OUT_FEATURES), jnp.float32),
        grid=(n_tiles,),
        in_specs=[
            pl.BlockSpec((tb, IN_FEATURES), lambda i: (i, 0)),   # x tile (f32)
            resident((IN_FEATURES, H1)),                         # w1
            resident((1, H1)),                                   # b1
            resident((H1, H2)),                                  # w2
            resident((1, H2)),                                   # b2
            resident((H2, OUT_FEATURES)),                        # w3
            resident((1, OUT_FEATURES)),                         # b3
        ],
        out_specs=pl.BlockSpec((tb, OUT_FEATURES), lambda i: (i, 0)),
        compiler_params=pltpu.CompilerParams(
            dimension_semantics=("parallel",),
        ),
    )(x_flat, w1, b1, w2, b2, w3, b3)

    if b_pad != batch:
        out = out[:batch]
    return out


def init_params(key):
    """Deterministic init mirroring nn.Linear. Weights stored (in, out), bf16."""
    k1, k2, k3, k4, k5, k6 = jax.random.split(key, 6)

    def lin(kw, kb, fan_in, fan_out):
        bound = 1.0 / jnp.sqrt(fan_in)
        w = jax.random.uniform(kw, (fan_in, fan_out), jnp.float32, -bound, bound)
        b = jax.random.uniform(kb, (1, fan_out), jnp.float32, -bound, bound)
        return w, b

    w1, b1 = lin(k1, k2, IN_FEATURES, H1)
    w2, b2 = lin(k3, k4, H1, H2)
    w3, b3 = lin(k5, k6, H2, OUT_FEATURES)

    return (w1.astype(jnp.bfloat16), b1,
            w2.astype(jnp.bfloat16), b2,
            w3.astype(jnp.bfloat16), b3)


def reference_forward(x_nchw, params):
    """Pure-JAX reference using the same bf16 operands (for validation)."""
    w1, b1, w2, b2, w3, b3 = params
    batch = x_nchw.shape[0]
    x = x_nchw.reshape(batch, -1).astype(jnp.float32).astype(jnp.bfloat16)
    h1 = jnp.maximum(jnp.dot(x, w1, preferred_element_type=jnp.float32) + b1, 0.0)
    h2 = jnp.maximum(jnp.dot(h1.astype(jnp.bfloat16), w2,
                             preferred_element_type=jnp.float32) + b2, 0.0)
    logits = jnp.dot(h2.astype(jnp.bfloat16), w3,
                     preferred_element_type=jnp.float32) + b3
    return jax.nn.log_softmax(logits, axis=1)


def _check(x, params):
    out = jax.block_until_ready(mnist_classifier_forward(x, params))
    batch = x.shape[0]
    assert out.shape == (batch, OUT_FEATURES)
    assert bool(jnp.all(jnp.isfinite(out)))
    # log-softmax rows exp-sum to 1
    row_sums = jnp.sum(jnp.exp(out), axis=1)
    assert bool(jnp.all(jnp.abs(row_sums - 1.0) < 1e-4))
    # agree with pure-JAX reference built from the same bf16 operands
    ref = reference_forward(x, params)
    assert bool(jnp.all(jnp.abs(out - ref) < 2e-2))


if __name__ == "__main__":
    key = jax.random.PRNGKey(0)
    kx, kx2, kp = jax.random.split(key, 3)

    params = init_params(kp)

    # Small case (single 16-row tile, padded batch rows sliced off).
    x_small = jax.random.normal(kx, (2, 1, 28, 28), dtype=jnp.float32)
    _check(x_small, params)

    # Multi-tile case (exercises the >=2-tile grid / megacore path).
    x_multi = jax.random.normal(kx2, (50, 1, 28, 28), dtype=jnp.float32)
    _check(x_multi, params)

    print("KERNEL_OK")
</pallas_src>

<mosaic_0001>
module attributes {stable_mosaic.version = 11 : i64} {
  func.func @mlp_kernel(%arg0: i32, %arg1: memref<16x784xf32, #tpu.memory_space<vmem>>, %arg2: memref<784x128xbf16, #tpu.memory_space<vmem>>, %arg3: memref<1x128xf32, #tpu.memory_space<vmem>>, %arg4: memref<128x256xbf16, #tpu.memory_space<vmem>>, %arg5: memref<1x256xf32, #tpu.memory_space<vmem>>, %arg6: memref<256x10xbf16, #tpu.memory_space<vmem>>, %arg7: memref<1x10xf32, #tpu.memory_space<vmem>>, %arg8: memref<16x10xf32, #tpu.memory_space<vmem>>) attributes {dimension_semantics = [#tpu.dimension_semantics<parallel>], iteration_bounds = array<i64: 1>, scalar_prefetch = 0 : i64, scratch_operands = 0 : i64, tpu.core_type = #tpu.core_type<tc>, window_params = [{transform_indices = @transform_0, window_bounds = array<i64: 16, 784>}, {pipeline_mode = #tpu.pipeline_mode<synchronous>, transform_indices = @transform_1, window_bounds = array<i64: 784, 128>}, {pipeline_mode = #tpu.pipeline_mode<synchronous>, transform_indices = @transform_2, window_bounds = array<i64: 1, 128>}, {pipeline_mode = #tpu.pipeline_mode<synchronous>, transform_indices = @transform_3, window_bounds = array<i64: 128, 256>}, {pipeline_mode = #tpu.pipeline_mode<synchronous>, transform_indices = @transform_4, window_bounds = array<i64: 1, 256>}, {pipeline_mode = #tpu.pipeline_mode<synchronous>, transform_indices = @transform_5, window_bounds = array<i64: 256, 10>}, {pipeline_mode = #tpu.pipeline_mode<synchronous>, transform_indices = @transform_6, window_bounds = array<i64: 1, 10>}, {transform_indices = @transform_7, window_bounds = array<i64: 16, 10>}]} {
    %c0 = arith.constant 0 : index
    %c0_0 = arith.constant 0 : index
    %0 = vector.load %arg1[%c0, %c0_0] : memref<16x784xf32, #tpu.memory_space<vmem>>, vector<16x784xf32>
    %1 = arith.truncf %0 : vector<16x784xf32> to vector<16x784xbf16>
    %c0_1 = arith.constant 0 : index
    %c0_2 = arith.constant 0 : index
    %2 = vector.load %arg2[%c0_1, %c0_2] : memref<784x128xbf16, #tpu.memory_space<vmem>>, vector<784x128xbf16>
    %cst = arith.constant dense<0.000000e+00> : vector<16x128xf32>
    %3 = tpu.matmul %1, %2, %cst {dimension_numbers = #tpu.dot_dimension_numbers<[1], [0], [0], [1], [0, 0, 1, 1], [], []>} : vector<16x784xbf16>, vector<784x128xbf16>, vector<16x128xf32> -> vector<16x128xf32>
    %c0_3 = arith.constant 0 : index
    %c0_4 = arith.constant 0 : index
    %4 = vector.load %arg3[%c0_3, %c0_4] : memref<1x128xf32, #tpu.memory_space<vmem>>, vector<1x128xf32>
    %5 = vector.broadcast %4 : vector<1x128xf32> to vector<16x128xf32>
    %6 = arith.addf %3, %5 : vector<16x128xf32>
    %cst_5 = arith.constant 0.000000e+00 : f32
    %7 = vector.broadcast %cst_5 : f32 to vector<16x128xf32>
    %8 = arith.maximumf %6, %7 : vector<16x128xf32>
    %9 = arith.truncf %8 : vector<16x128xf32> to vector<16x128xbf16>
    %c0_6 = arith.constant 0 : index
    %c0_7 = arith.constant 0 : index
    %10 = vector.load %arg4[%c0_6, %c0_7] : memref<128x256xbf16, #tpu.memory_space<vmem>>, vector<128x256xbf16>
    %cst_8 = arith.constant dense<0.000000e+00> : vector<16x256xf32>
    %11 = tpu.matmul %9, %10, %cst_8 {dimension_numbers = #tpu.dot_dimension_numbers<[1], [0], [0], [1], [0, 0, 1, 1], [], []>} : vector<16x128xbf16>, vector<128x256xbf16>, vector<16x256xf32> -> vector<16x256xf32>
    %c0_9 = arith.constant 0 : index
    %c0_10 = arith.constant 0 : index
    %12 = vector.load %arg5[%c0_9, %c0_10] : memref<1x256xf32, #tpu.memory_space<vmem>>, vector<1x256xf32>
    %13 = vector.broadcast %12 : vector<1x256xf32> to vector<16x256xf32>
    %14 = arith.addf %11, %13 : vector<16x256xf32>
    %cst_11 = arith.constant 0.000000e+00 : f32
    %15 = vector.broadcast %cst_11 : f32 to vector<16x256xf32>
    %16 = arith.maximumf %14, %15 : vector<16x256xf32>
    %17 = arith.truncf %16 : vector<16x256xf32> to vector<16x256xbf16>
    %c0_12 = arith.constant 0 : index
    %c0_13 = arith.constant 0 : index
    %18 = vector.load %arg6[%c0_12, %c0_13] : memref<256x10xbf16, #tpu.memory_space<vmem>>, vector<256x10xbf16>
    %cst_14 = arith.constant dense<0.000000e+00> : vector<16x10xf32>
    %19 = tpu.matmul %17, %18, %cst_14 {dimension_numbers = #tpu.dot_dimension_numbers<[1], [0], [0], [1], [0, 0, 1, 1], [], []>} : vector<16x256xbf16>, vector<256x10xbf16>, vector<16x10xf32> -> vector<16x10xf32>
    %c0_15 = arith.constant 0 : index
    %c0_16 = arith.constant 0 : index
    %20 = vector.load %arg7[%c0_15, %c0_16] : memref<1x10xf32, #tpu.memory_space<vmem>>, vector<1x10xf32>
    %21 = vector.broadcast %20 : vector<1x10xf32> to vector<16x10xf32>
    %22 = arith.addf %19, %21 : vector<16x10xf32>
    %cst_17 = arith.constant dense<0xFF800000> : vector<16xf32>
    %23 = vector.multi_reduction <maximumf>, %22, %cst_17 [1] : vector<16x10xf32> to vector<16xf32>
    %24 = vector.shape_cast %23 : vector<16xf32> to vector<16x1xf32>
    %25 = vector.broadcast %24 : vector<16x1xf32> to vector<16x10xf32>
    %26 = arith.subf %22, %25 : vector<16x10xf32>
    %27 = math.exp %26 : vector<16x10xf32>
    %cst_18 = arith.constant dense<0.000000e+00> : vector<16xf32>
    %28 = vector.multi_reduction <add>, %27, %cst_18 [1] : vector<16x10xf32> to vector<16xf32>
    %29 = vector.shape_cast %28 : vector<16xf32> to vector<16x1xf32>
    %30 = math.log %29 : vector<16x1xf32>
    %31 = vector.broadcast %30 : vector<16x1xf32> to vector<16x10xf32>
    %32 = arith.subf %26, %31 : vector<16x10xf32>
    %c0_19 = arith.constant 0 : index
    %c0_20 = arith.constant 0 : index
    %33 = vector.load %arg8[%c0_19, %c0_20] : memref<16x10xf32, #tpu.memory_space<vmem>>, vector<16x10xf32>
    tpu.vector_store %arg8[%c0_19, %c0_20], %32 {strides = array<i32>} : memref<16x10xf32, #tpu.memory_space<vmem>>, vector<16x10xf32>,
    return
  }
  func.func @transform_0(%arg0: i32) -> (i32, i32) {
    %c0_i32 = arith.constant 0 : i32
    %c0_i32_0 = arith.constant 0 : i32
    return %arg0, %c0_i32 : i32, i32
  }
  func.func @transform_1(%arg0: i32) -> (i32, i32) {
    %c0_i32 = arith.constant 0 : i32
    %c0_i32_0 = arith.constant 0 : i32
    %c0_i32_1 = arith.constant 0 : i32
    return %c0_i32, %c0_i32_0 : i32, i32
  }
  func.func @transform_2(%arg0: i32) -> (i32, i32) {
    %c0_i32 = arith.constant 0 : i32
    %c0_i32_0 = arith.constant 0 : i32
    %c0_i32_1 = arith.constant 0 : i32
    return %c0_i32, %c0_i32_0 : i32, i32
  }
  func.func @transform_3(%arg0: i32) -> (i32, i32) {
    %c0_i32 = arith.constant 0 : i32
    %c0_i32_0 = arith.constant 0 : i32
    %c0_i32_1 = arith.constant 0 : i32
    return %c0_i32, %c0_i32_0 : i32, i32
  }
  func.func @transform_4(%arg0: i32) -> (i32, i32) {
    %c0_i32 = arith.constant 0 : i32
    %c0_i32_0 = arith.constant 0 : i32
    %c0_i32_1 = arith.constant 0 : i32
    return %c0_i32, %c0_i32_0 : i32, i32
  }
  func.func @transform_5(%arg0: i32) -> (i32, i32) {
    %c0_i32 = arith.constant 0 : i32
    %c0_i32_0 = arith.constant 0 : i32
    %c0_i32_1 = arith.constant 0 : i32
    return %c0_i32, %c0_i32_0 : i32, i32
  }
  func.func @transform_6(%arg0: i32) -> (i32, i32) {
    %c0_i32 = arith.constant 0 : i32
    %c0_i32_0 = arith.constant 0 : i32
    %c0_i32_1 = arith.constant 0 : i32
    return %c0_i32, %c0_i32_0 : i32, i32
  }
  func.func @transform_7(%arg0: i32) -> (i32, i32) {
    %c0_i32 = arith.constant 0 : i32
    %c0_i32_0 = arith.constant 0 : i32
    return %arg0, %c0_i32 : i32, i32
  }
}

</mosaic_0001>

<bundles_post_ra>
// kernel: tpu_custom_call.1
= control target key start
LH: loop header
LB: loop body
LE: loop exit
PB: predicated region body
PF: predicated region fallthrough
CT: control target
= control target key end

     0   :  { %12 = vsyncpa [#allocation3], 0  ;;  %s1585_s0 = inlined_call_operand.hbm [shape: f32[16,784], index: 0, kind: input, shape index: {}]   ;;  %s1586_s1 = inlined_call_operand.hbm [shape: bf16[784,128], index: 1, kind: input, shape index: {}]   ;;  %s1587_s2 = inlined_call_operand.vmem [shape: f32[1,128], index: 2, kind: input, shape index: {}]   ;;  %s1588_s3 = inlined_call_operand.vmem [shape: bf16[128,256], index: 3, kind: input, shape index: {}]   ;;  %s1589_s4 = inlined_call_operand.vmem [shape: f32[1,256], index: 4, kind: input, shape index: {}]   ;;  %s1590_s5 = inlined_call_operand.vmem [shape: bf16[256,10], index: 5, kind: input, shape index: {}]   ;;  %s1591_s6 = inlined_call_operand.vmem [shape: f32[1,10], index: 6, kind: input, shape index: {}]   ;;  %s1592_s7 = inlined_call_operand.hbm [shape: f32[16,10], index: 7, kind: output, shape index: {}]  }
   0x1   :  { %13 = vsyncpa [#allocation6], 0 }
   0x2   :  { %14 = vsyncpa [#allocation4], 0  ;;  %s1386_s24 = smov [#allocation2]   ;;  %s1314_s28 = scalar_lea.hbm %s1585_s0, 1792 }
   0x3   :  { %s20_s25 = sshll.u32 %s1386_s24, 4  ;;  %p1315_p0 = scmp.ne.s32.totalorder %s1585_s0, %s1314_s28  ;;  %s21_s25 = int_to_ptr.vmem [resolvable:$true] %s20_s25 }
   0x4   :  { %p1318_p1 = scmp.lt.u32.totalorder %s1314_s28, %s1585_s0 }
   0x6   :  { %p1320_p2 = pnand %p1318_p1, %p1315_p0 }
   0x8   :  { %1323 = shalt.err (!%p1320_p2)
}
   0x9   :  { %s1324_s10 = scalar_lea.vmem %s21_s25, 1792  ;;  %p1329_p4 = scmp.lt.s32.totalorder %s21_s25, %s21_s25 }
   0xa   :  { %p1325_p3 = scmp.ne.s32.totalorder %s21_s25, %s1324_s10  ;;  %p1330_p5 = scmp.lt.s32.totalorder %s1324_s10, %s1324_s10 }
   0xc   :  { %p1331_p6 = por %p1330_p5, %p1329_p4 }
   0xe   :  { %p1332_p7 = pnand %p1331_p6, %p1325_p3 }
  0x10   :  { %1335 = shalt.err (!%p1332_p7)
}
  0x11   :  { %s1387_s11 = smov 896   ;;  %s1388_s12 = smov 56  }
  0x12   :  { %26 = dma.hbm_to_vmem [thread:$0]  %s1585_s0, 1792, %s21_s25, [#allocation3], %s1387_s11, %s1387_s11, %s1388_s12  }
  0x13   :  { %s1389_s15 = smov [#allocation5]   ;;  %s1336_s19 = scalar_lea.hbm %s1586_s1, 6272 }
  0x14   :  { %s32_s16 = sshll.u32 %s1389_s15, 4  ;;  %p1337_p8 = scmp.ne.s32.totalorder %s1586_s1, %s1336_s19  ;;  %s33_s16 = int_to_ptr.vmem [resolvable:$true] %s32_s16 }
  0x15   :  { %p1340_p9 = scmp.lt.u32.totalorder %s1336_s19, %s1586_s1 }
  0x17   :  { %p1342_p10 = pnand %p1340_p9, %p1337_p8 }
  0x19   :  { %1345 = shalt.err (!%p1342_p10)
}
  0x1a   :  { %s1346_s24 = scalar_lea.vmem %s33_s16, 6272  ;;  %p1351_p12 = scmp.lt.s32.totalorder %s33_s16, %s33_s16 }
  0x1b   :  { %p1347_p11 = scmp.ne.s32.totalorder %s33_s16, %s1346_s24  ;;  %p1352_p13 = scmp.lt.s32.totalorder %s1346_s24, %s1346_s24 }
  0x1d   :  { %p1353_p0 = por %p1352_p13, %p1351_p12 }
  0x1f   :  { %p1354_p1 = pnand %p1353_p0, %p1347_p11 }
  0x21   :  { %1357 = shalt.err (!%p1354_p1)
}
  0x22   :  { %s1390_s0 = smov 64   ;;  %s1391_s25 = smov 4  }
  0x23   :  { %38 = dma.hbm_to_vmem [thread:$0]  %s1586_s1, 6272, %s33_s16, [#allocation6], %s1390_s0, %s1390_s0, %s1391_s25  }
  0x24   :  { %1380 = dma.done.wait [#allocation3], 1792  }
  0x25   :  { %1381 = vsyncadd [#allocation3], 4294965504 }
  0x26   :  { %1382 = dma.done.wait [#allocation6], 6272  }
  0x27   :  { %1383 = vsyncadd [#allocation6], 4294961024  ;;  %v1217_v0 = vld [vmem:[#allocation5 + $0x40] sm:$0xff]   ;;  %v1221_v4 = vld [vmem:[#allocation5 + $0x48] sm:$0xff]   ;;  %v1392_v43 = vmov 0.0   ;;  %vm1393_vm0 = vmmov 0  }
  0x28   :  { %v1218_v1 = vld [vmem:[#allocation5] sm:$0xff]   ;;  %1109 = vmatprep.subr.bf16.mxu0 %v1217_v0  ;;  %v1222_v5 = vld [vmem:[#allocation5 + $0x8] sm:$0xff]   ;;  %v1225_v8 = vld [vmem:[#allocation5 + $0x50] sm:$0xff]   ;;  %vm476_vm1 = vcmask 130048   ;;  %vm980_vm2 = vcmask 80896  }
  0x29   :  { %v1219_v2 = vld [vmem:[#allocation5 + $0xc0] sm:$0xff]   ;;  %1110 = vmatpush3.bf16.msra.mxu0 %v1218_v1  ;;  %v1223_v6 = vld [vmem:[#allocation5 + $0xc8] sm:$0xff]   ;;  %v1226_v9 = vld [vmem:[#allocation5 + $0x10] sm:$0xff]  }
  0x2a   :  { %v1220_v3 = vld [vmem:[#allocation5 + $0x80] sm:$0xff]   ;;  %1131 = vmatprep.subr.bf16.mxu1 %v1219_v2  ;;  %1111 = vmatprep.subr.bf16.mxu0 %v1221_v4  ;;  %v1224_v7 = vld [vmem:[#allocation5 + $0x88] sm:$0xff]   ;;  %v1227_v10 = vld [vmem:[#allocation5 + $0xd0] sm:$0xff]  }
  0x2b   :  { %1132 = vmatpush3.bf16.msra.mxu1 %v1220_v3  ;;  %v1228_v11 = vld [vmem:[#allocation5 + $0x90] sm:$0xff]   ;;  %v1229_v12 = vld [vmem:[#allocation5 + $0x58] sm:$0xff]   ;;  %v1233_v16 = vld [vmem:[#allocation5 + $0x60] sm:$0xff]  }
  0x2c   :  { %1133 = vmatprep.subr.bf16.mxu1 %v1223_v6  ;;  %v1230_v13 = vld [vmem:[#allocation5 + $0x18] sm:$0xff]   ;;  %v1234_v17 = vld [vmem:[#allocation5 + $0x20] sm:$0xff]   ;;  %v1237_v20 = vld [vmem:[#allocation5 + $0x68] sm:$0xff]  }
  0x2d   :  { %1112 = vmatpush3.bf16.msra.mxu0 %v1222_v5  ;;  %v1231_v14 = vld [vmem:[#allocation5 + $0xd8] sm:$0xff]   ;;  %v1235_v18 = vld [vmem:[#allocation5 + $0xe0] sm:$0xff]   ;;  %v1238_v21 = vld [vmem:[#allocation5 + $0x28] sm:$0xff]  }
  0x2e   :  { %1113 = vmatprep.subr.bf16.mxu0 %v1225_v8  ;;  %v1232_v15 = vld [vmem:[#allocation5 + $0x98] sm:$0xff]   ;;  %v1236_v19 = vld [vmem:[#allocation5 + $0xa0] sm:$0xff]   ;;  %v1239_v22 = vld [vmem:[#allocation5 + $0xe8] sm:$0xff]  }
  0x2f   :  { %1134 = vmatpush3.bf16.msra.mxu1 %v1224_v7  ;;  %v1240_v23 = vld [vmem:[#allocation5 + $0xa8] sm:$0xff]   ;;  %v1241_v24 = vld [vmem:[#allocation5 + $0x70] sm:$0xff]   ;;  %v1245_v28 = vld [vmem:[#allocation5 + $0x78] sm:$0xff]  }
  0x30   :  { %1135 = vmatprep.subr.bf16.mxu1 %v1227_v10  ;;  %v1242_v25 = vld [vmem:[#allocation5 + $0x30] sm:$0xff]   ;;  %v1246_v29 = vld [vmem:[#allocation5 + $0x38] sm:$0xff]   ;;  %v63_v36 = vld [vmem:[#allocation2 + $0x38] sm:$0xff] }
  0x31   :  { %1114 = vmatpush3.bf16.msra.mxu0 %v1226_v9  ;;  %v1243_v26 = vld [vmem:[#allocation5 + $0xf0] sm:$0xff]   ;;  %v1247_v30 = vld [vmem:[#allocation5 + $0xf8] sm:$0xff]   ;;  %v1249_v38 = vld [vmem:[#allocation5 + $0x140] sm:$0xff]  }
  0x32   :  { %1115 = vmatprep.subr.bf16.mxu0 %v1229_v12  ;;  %v1244_v27 = vld [vmem:[#allocation5 + $0xb0] sm:$0xff]   ;;  %v57_v31 = vld [vmem:[#allocation2 + $0x8] sm:$0xff]  ;;  %v59_v39 = vld [vmem:[#allocation2 + $0x18] sm:$0xff] }
  0x33   :  { %1136 = vmatpush3.bf16.msra.mxu1 %v1228_v11  ;;  %v64_v32 = vld [vmem:[#allocation2 + $0x40] sm:$0xff]  ;;  %v1248_v34 = vld [vmem:[#allocation5 + $0xb8] sm:$0xff]   ;;  %v66_v40 = vld [vmem:[#allocation2 + $0x50] sm:$0xff] }
  0x34   :  { %1137 = vmatprep.subr.bf16.mxu1 %v1231_v14  ;;  %v71_v33 = vpack.c.bf16 %v64_v32, %v57_v31  ;;  %v56_v35 = vld [vmem:[#allocation2] sm:$0xff]  ;;  %v73_v41 = vpack.c.bf16 %v66_v40, %v59_v39  ;;  %v1250_v42 = vld [vmem:[#allocation5 + $0x100] sm:$0xff]   ;;  %v65_v45 = vld [vmem:[#allocation2 + $0x48] sm:$0xff] }
  0x35   :  { %1116 = vmatpush3.bf16.msra.mxu0 %v1230_v13  ;;  %v70_v37 = vpack.c.bf16 %v63_v36, %v56_v35  ;;  %v58_v44 = vld [vmem:[#allocation2 + $0x10] sm:$0xff]  ;;  %v1251_v47 = vld [vmem:[#allocation5 + $0x148] sm:$0xff]   ;;  %v1253_v49 = vld [vmem:[#allocation5 + $0x150] sm:$0xff]  }
  0x36   :  { %1117 = vmatprep.subr.bf16.mxu0 %v1233_v16  ;;  %512 = vmatprep.mubr.bf16.mxu0 %v71_v33  ;;  %v72_v46 = vpack.c.bf16 %v65_v45, %v58_v44  ;;  %v1252_v48 = vld [vmem:[#allocation5 + $0x108] sm:$0xff]   ;;  %v1254_v50 = vld [vmem:[#allocation5 + $0x110] sm:$0xff]   ;;  %v1255_v51 = vld [vmem:[#allocation5 + $0x158] sm:$0xff]  }
  0x37   :  { %1138 = vmatpush3.bf16.msra.mxu1 %v1232_v15  ;;  %553 = vmatprep.mubr.bf16.mxu1 %v73_v41  ;;  %v1256_v52 = vld [vmem:[#allocation5 + $0x118] sm:$0xff]   ;;  %v1257_v53 = vld [vmem:[#allocation5 + $0x160] sm:$0xff]   ;;  %v1259_v55 = vld [vmem:[#allocation5 + $0x168] sm:$0xff]  }
  0x38   :  { %1139 = vmatprep.subr.bf16.mxu1 %v1235_v18  ;;  %v1258_v54 = vld [vmem:[#allocation5 + $0x120] sm:$0xff]   ;;  %v61_v57 = vld [vmem:[#allocation2 + $0x28] sm:$0xff]  ;;  %v1260_v58 = vld [vmem:[#allocation5 + $0x128] sm:$0xff]  }
  0x39   :  { %1118 = vmatpush3.bf16.msra.mxu0 %v1234_v17  ;;  %v1265_v56 = vld [vmem:[#allocation5 + $0x180] sm:$0xff]   ;;  %v1261_v59 = vld [vmem:[#allocation5 + $0x170] sm:$0xff]   ;;  %v69_v63 = vld [vmem:[#allocation2 + $0x68] sm:$0xff] }
  0x3a   :  { %1119 = vmatprep.subr.bf16.mxu0 %v1237_v20  ;;  %v68_v60 = vld [vmem:[#allocation2 + $0x60] sm:$0xff]  ;;  %v62_v62 = vld [vmem:[#allocation2 + $0x30] sm:$0xff]  ;;  %v1263_v2 = vld [vmem:[#allocation5 + $0x178] sm:$0xff]  }
  0x3b   :  { %1140 = vmatpush3.bf16.msra.mxu1 %v1236_v19  ;;  %v75_v61 = vpack.c.bf16 %v68_v60, %v61_v57  ;;  %v76_v0 = vpack.c.bf16 %v69_v63, %v62_v62  ;;  %v1262_v1 = vld [vmem:[#allocation5 + $0x130] sm:$0xff]   ;;  %v1264_v3 = vld [vmem:[#allocation5 + $0x138] sm:$0xff]   ;;  %v67_v5 = vld [vmem:[#allocation2 + $0x58] sm:$0xff] }
  0x3c   :  { %1141 = vmatprep.subr.bf16.mxu1 %v1239_v22  ;;  %v60_v4 = vld [vmem:[#allocation2 + $0x20] sm:$0xff]  ;;  %v1271_v9 = vld [vmem:[%s1588_s3 + $0x14] ss:$8 sps:$4 sm:$0xff]   ;;  %v1269_v10 = vld [vmem:[%s1588_s3 + $0x10] ss:$8 sps:$4 sm:$0xff]  }
  0x3d   :  { %1120 = vmatpush3.bf16.msra.mxu0 %v1238_v21  ;;  %v74_v6 = vpack.c.bf16 %v67_v5, %v60_v4  ;;  %v1266_v7 = vld [vmem:[%s1588_s3] ss:$8 sps:$4 sm:$0xff]   ;;  %v1268_v8 = vld [vmem:[%s1588_s3 + $0x4] ss:$8 sps:$4 sm:$0xff]   ;;  %v1277_v13 = vld [vmem:[%s1588_s3 + $0x34] ss:$8 sps:$4 sm:$0xff]  }
  0x3e   :  { %1121 = vmatprep.subr.bf16.mxu0 %v1241_v24  ;;  %v1274_v11 = vld [vmem:[%s1588_s3 + $0x24] ss:$8 sps:$4 sm:$0xff]   ;;  %v1272_v12 = vld [vmem:[%s1588_s3 + $0x20] ss:$8 sps:$4 sm:$0xff]   ;;  %v1275_v14 = vld [vmem:[%s1588_s3 + $0x30] ss:$8 sps:$4 sm:$0xff]  }
  0x3f   :  { %1142 = vmatpush3.bf16.msra.mxu1 %v1240_v23  ;;  %v1280_v15 = vld [vmem:[%s1588_s3 + $0x44] ss:$8 sps:$4 sm:$0xff]   ;;  %v1278_v16 = vld [vmem:[%s1588_s3 + $0x40] ss:$8 sps:$4 sm:$0xff]   ;;  %v1283_v17 = vld [vmem:[%s1588_s3 + $0x54] ss:$8 sps:$4 sm:$0xff]  }
  0x40   :  { %1143 = vmatprep.subr.bf16.mxu1 %v1243_v26  ;;  %v1281_v18 = vld [vmem:[%s1588_s3 + $0x50] ss:$8 sps:$4 sm:$0xff]   ;;  %v1286_v19 = vld [vmem:[%s1588_s3 + $0x64] ss:$8 sps:$4 sm:$0xff]   ;;  %v1284_v20 = vld [vmem:[%s1588_s3 + $0x60] ss:$8 sps:$4 sm:$0xff]  }
  0x41   :  { %1122 = vmatpush3.bf16.msra.mxu0 %v1242_v25  ;;  %v1289_v21 = vld [vmem:[%s1588_s3 + $0x74] ss:$8 sps:$4 sm:$0xff]   ;;  %v1287_v22 = vld [vmem:[%s1588_s3 + $0x70] ss:$8 sps:$4 sm:$0xff]   ;;  %v1394_v23 = vmov 0   ;;  %v1290_v24 = vld [vmem:[%s1590_s5 + $0x40] sm:$0xff]  }
  0x42   :  { %1123 = vmatprep.subr.bf16.mxu0 %v1245_v28  ;;  %v1291_v25 = vld [vmem:[%s1590_s5] sm:$0xff]   ;;  %v1292_v26 = vld [vmem:[%s1590_s5 + $0x48] sm:$0xff]   ;;  %v1294_v28 = vld [vmem:[%s1590_s5 + $0x50] sm:$0xff]  }
  0x43   :  { %1144 = vmatpush3.bf16.msra.mxu1 %v1244_v27  ;;  %v1293_v27 = vld [vmem:[%s1590_s5 + $0x8] sm:$0xff]   ;;  %v1297_v31 = vld [vmem:[%s1590_s5 + $0x18] sm:$0xff]   ;;  %v1298_v32 = vld [vmem:[%s1590_s5 + $0x60] sm:$0xff]  }
  0x44   :  { %1145 = vmatprep.subr.bf16.mxu1 %v1247_v30  ;;  %v1296_v30 = vld [vmem:[%s1590_s5 + $0x58] sm:$0xff]   ;;  %v1299_v33 = vld [vmem:[%s1590_s5 + $0x20] sm:$0xff]   ;;  %v1301_v5 = vld [vmem:[%s1590_s5 + $0x28] sm:$0xff]  }
  0x45   :  { %1124 = vmatpush3.bf16.msra.mxu0 %v1246_v29  ;;  %v1295_v29 = vld [vmem:[%s1590_s5 + $0x10] sm:$0xff]   ;;  %v1025_v36 = vld [vmem:[%s1587_s2] ss:$0 sm:$0xff] }
  0x46   :  { %1153 = vmatprep.subr.bf16.mxu0 %v1249_v38 }
  0x47   :  { %1146 = vmatpush3.bf16.msra.mxu1 %v1248_v34  ;;  %v1300_v34 = vld [vmem:[%s1590_s5 + $0x68] sm:$0xff]  }
  0x48   :  { %1199 = vmatprep.subr.bf16.mxu1 %v1392_v43  ;;  %513 = vmatmul.mubr.bf16.vlgmr.msra.gmra.mrb[0].mxu0 %v70_v37 }
  0x49   :  { %1154 = vmatpush3.bf16.msra.mxu0 %v1250_v42  ;;  %594 = vmatprep.mubr.bf16.mxu0 %v75_v61 }
  0x4a   :  { %554 = vmatmul.mubr.bf16.vlgmr.msra.gmra.mrb[0].mxu1 %v72_v46  ;;  %1155 = vmatprep.subr.bf16.mxu0 %v1251_v47 }
  0x4b   :  { %1201 = vmatprep.mubr.msk.bf16.mxu1 %vm1393_vm0, %v1392_v43  ;;  %1200 = vmatpush3.bf16.msra.mxu1 %v1265_v56 }
  0x4c   :  { %755 = vmatprep.subr.bf16.mxu1 %v1268_v8  ;;  %v1304_v8 = vld [vmem:[%s1590_s5 + $0x78] sm:$0xff]  }
  0x4d   :  { %1156 = vmatpush3.bf16.msra.mxu0 %v1252_v48 }
  0x4e   :  { %1157 = vmatprep.subr.bf16.mxu0 %v1253_v49 }
  0x51   :  { %1158 = vmatpush3.bf16.msra.mxu0 %v1254_v50 }
  0x52   :  { %1159 = vmatprep.subr.bf16.mxu0 %v1255_v51  ;;  %1202 = vmatmul.mubr.msk.bf16.vlgmr.msra.gmra.mrb[4].mxu1 %vm476_vm1, %v76_v0 }
  0x53   :  { %756 = vmatpush1.bf16.msra.mxu1 %v1266_v7  ;;  %787 = vmatprep.mubr.bf16.mxu1 %v1394_v23  ;;  %v1303_v7 = vld [vmem:[%s1590_s5 + $0x30] sm:$0xff]  }
  0x54   :  { %757 = vmatprep.subr.bf16.mxu1 %v1271_v9  ;;  %v1305_v9 = vld [vmem:[%s1590_s5 + $0x38] sm:$0xff]  }
  0x55   :  { %1160 = vmatpush3.bf16.msra.mxu0 %v1256_v52 }
  0x56   :  { %1161 = vmatprep.subr.bf16.mxu0 %v1257_v53 }
  0x57   :  { %758 = vmatpush1.bf16.msra.mxu1 %v1269_v10  ;;  %v665_v10 = vlaneseq }
  0x58   :  { %759 = vmatprep.subr.bf16.mxu1 %v1274_v11 }
  0x59   :  { %1162 = vmatpush3.bf16.msra.mxu0 %v1258_v54  ;;  %v666_v11 = vshrl.u32 %v665_v10, 7 }
  0x5a   :  { %1163 = vmatprep.subr.bf16.mxu0 %v1259_v55 }
  0x5b   :  { %760 = vmatpush1.bf16.msra.mxu1 %v1272_v12  ;;  %v667_v12 = vsub.s32 0, %v666_v11 }
  0x5c   :  { %761 = vmatprep.subr.bf16.mxu1 %v1277_v13  ;;  %v663_v13 = vld [vmem:[%s1589_s4] sm:$0x3] }
  0x5d   :  { %1164 = vmatpush3.bf16.msra.mxu0 %v1260_v58 }
  0x5e   :  { %1165 = vmatprep.subr.bf16.mxu0 %v1261_v59 }
  0x5f   :  { %762 = vmatpush1.bf16.msra.mxu1 %v1275_v14  ;;  %v671_v14 = vsub.s32 1, %v666_v11 }
  0x60   :  { %763 = vmatprep.subr.bf16.mxu1 %v1280_v15  ;;  %v668_v15 = vrot.slane %v663_v13, %v667_v12 }
  0x61   :  { %1166 = vmatpush3.bf16.msra.mxu0 %v1262_v1 }
  0x62   :  { %1167 = vmatprep.subr.bf16.mxu0 %v1263_v2 }
  0x63   :  { %764 = vmatpush1.bf16.msra.mxu1 %v1278_v16  ;;  %v672_v16 = vrot.slane %v663_v13, %v671_v14 }
  0x64   :  { %765 = vmatprep.subr.bf16.mxu1 %v1283_v17 }
  0x65   :  { %1168 = vmatpush3.bf16.msra.mxu0 %v1264_v3 }
  0x66   :  { %1177 = vmatprep.subr.bf16.mxu0 %v1290_v24 }
  0x67   :  { %766 = vmatpush1.bf16.msra.mxu1 %v1281_v18 }
  0x68   :  { %595 = vmatmul.mubr.bf16.vlgmr.msra.gmra.mrb[4].mxu0 %v74_v6  ;;  %767 = vmatprep.subr.bf16.mxu1 %v1286_v19  ;;  %v1302_v6 = vld [vmem:[%s1590_s5 + $0x70] sm:$0xff]  }
  0x69   :  { %1178 = vmatpush3.bf16.msra.mxu0 %v1291_v25 }
  0x6a   :  { %1179 = vmatprep.subr.bf16.mxu0 %v1292_v26 }
  0x6b   :  { %768 = vmatpush1.bf16.msra.mxu1 %v1284_v20 }
  0x6c   :  { %769 = vmatprep.subr.bf16.mxu1 %v1289_v21 }
  0x6d   :  { %1180 = vmatpush3.bf16.msra.mxu0 %v1293_v27 }
  0x6e   :  { %1181 = vmatprep.subr.bf16.mxu0 %v1294_v28 }
  0x6f   :  { %770 = vmatpush1.bf16.msra.mxu1 %v1287_v22 }
  0x71   :  { %1182 = vmatpush3.bf16.msra.mxu0 %v1295_v29 }
  0x72   :  { %1183 = vmatprep.subr.bf16.mxu0 %v1296_v30 }
  0x75   :  { %1184 = vmatpush3.bf16.msra.mxu0 %v1297_v31 }
  0x76   :  { %1185 = vmatprep.subr.bf16.mxu0 %v1298_v32 }
  0x79   :  { %1186 = vmatpush3.bf16.msra.mxu0 %v1299_v33  ;;  %v1092_v33 = vld [vmem:[%s1591_s6] ss:$0 sm:$0xff]  ;;  %s1395_s6 = smov [#allocation7]  }
  0x7a   :  { %1187 = vmatprep.subr.bf16.mxu0 %v1300_v34  ;;  %s1012_s19 = sshll.u32 %s1395_s6, 4  ;;  %s1013_s19 = int_to_ptr.vmem [resolvable:$true] %s1012_s19 }
  0x7b   :  { %s1358_s20 = scalar_lea.vmem %s1013_s19, 256  ;;  %p1363_p3 = scmp.lt.s32.totalorder %s1013_s19, %s1013_s19 }
  0x7c   :  { %p1359_p2 = scmp.ne.s32.totalorder %s1013_s19, %s1358_s20  ;;  %p1364_p4 = scmp.lt.s32.totalorder %s1358_s20, %s1358_s20 }
  0x7d   :  { %1188 = vmatpush3.bf16.msra.mxu0 %v1301_v5 }
  0x7e   :  { %1189 = vmatprep.subr.bf16.mxu0 %v1302_v6  ;;  %p1365_p5 = por %p1364_p4, %p1363_p3 }
  0x80   :  { %p1366_p6 = pnand %p1365_p5, %p1359_p2 }
  0x81   :  { %1190 = vmatpush3.bf16.msra.mxu0 %v1303_v7 }
  0x82   :  { %1191 = vmatprep.subr.bf16.mxu0 %v1304_v8 }
  0x85   :  { %1192 = vmatpush3.bf16.msra.mxu0 %v1305_v9 }
 0x11b   :  { %v1125_v35 = vpop.f32.mrb[0].mxu0 }
 0x11c   :  { %v1126_v37 = vpop.f32.mrb[1].mxu0 }
 0x11d   :  { %v1127_v38 = vadd.f32 %v1126_v37, %v1125_v35  ;;  %v1128_v39 = vpop.f32.mrb[2].mxu0  ;;  %v1147_v40 = vpop.f32.mrb[0].mxu1 }
 0x11e   :  { %v1129_v41 = vpop.f32.mrb[3].mxu0  ;;  %v1148_v44 = vpop.f32.mrb[1].mxu1 }
 0x11f   :  { %v515_v42 = vadd.f32 %v1127_v38, %v1025_v36  ;;  %v1130_v43 = vadd.f32 %v1129_v41, %v1128_v39  ;;  %v1149_v45 = vadd.f32 %v1148_v44, %v1147_v40  ;;  %v1150_v46 = vpop.f32.mrb[2].mxu1 }
 0x120   :  { %v1151_v48 = vpop.f32.mrb[3].mxu1 }
 0x121   :  { %v518_v47 = vadd.f32 %v1130_v43, %v1025_v36  ;;  %v556_v49 = vadd.f32 %v1149_v45, %v515_v42  ;;  %v1152_v50 = vadd.f32 %v1151_v48, %v1150_v46 }
 0x123   :  { %v559_v51 = vadd.f32 %v1152_v50, %v518_v47 }
 0x125   :  { %v637_v52 = vpop.f32.mrb[4].mxu1 }
 0x126   :  { %v1203_v53 = vpop.f32.mrb[5].mxu1 }
 0x127   :  { %v640_v54 = vpop.f32.mrb[6].mxu1 }
 0x128   :  { %v1204_v55 = vpop.f32.mrb[7].mxu1 }
 0x13b   :  { %v1169_v56 = vpop.f32.mrb[4].mxu0 }
 0x13c   :  { %v1170_v57 = vpop.f32.mrb[5].mxu0 }
 0x13d   :  { %v1171_v58 = vadd.f32 %v1170_v57, %v1169_v56  ;;  %v1172_v59 = vpop.f32.mrb[6].mxu0 }
 0x13e   :  { %v1173_v60 = vpop.f32.mrb[7].mxu0 }
 0x13f   :  { %v597_v61 = vadd.f32 %v1171_v58, %v556_v49  ;;  %v1174_v62 = vadd.f32 %v1173_v60, %v1172_v59 }
 0x141   :  { %v638_v63 = vadd.f32 %v637_v52, %v597_v61  ;;  %v600_v0 = vadd.f32 %v1174_v62, %v559_v51 }
 0x143   :  { %v641_v1 = vadd.f32 %v640_v54, %v600_v0  ;;  %v644_v2 = vmax.f32 %v638_v63, 0.0 }
 0x145   :  { %v645_v3 = vmax.f32 %v641_v1, 0.0 }
 0x147   :  { %v646_v4 = vpack.c.bf16 %v645_v3, %v644_v2 }
 0x149   :  { %788 = vmatmul.mubr.bf16.vlgmr.msra.gmra.mrb[8].mxu1 %v646_v4 }
 0x21c   :  { %v789_v17 = vpop.f32.mrb[8].mxu1 }
 0x21d   :  { %v790_v18 = vadd.f32 %v789_v17, %v668_v15  ;;  %v791_v19 = vpop.f32.mrb[9].mxu1 }
 0x21e   :  { %v792_v20 = vadd.f32 %v791_v19, %v672_v16  ;;  %v793_v21 = vpop.f32.mrb[10].mxu1 }
 0x21f   :  { %v794_v22 = vadd.f32 %v793_v21, %v668_v15  ;;  %v795_v23 = vpop.f32.mrb[11].mxu1  ;;  %v798_v25 = vmax.f32 %v790_v18, 0.0 }
 0x220   :  { %v796_v24 = vadd.f32 %v795_v23, %v672_v16  ;;  %v799_v27 = vmax.f32 %v792_v20, 0.0 }
 0x221   :  { %v800_v26 = vmax.f32 %v794_v22, 0.0 }
 0x222   :  { %v801_v28 = vmax.f32 %v796_v24, 0.0 }
 0x223   :  { %v802_v29 = vpack.c.bf16 %v800_v26, %v798_v25 }
 0x224   :  { %v803_v30 = vpack.c.bf16 %v801_v28, %v799_v27 }
 0x226   :  { %971 = vmatprep.mubr.bf16.mxu0 %v803_v30 }
 0x227   :  { %972 = vmatmul.mubr.bf16.vlgmr.msra.gmra.mrb[8].mxu0 %v802_v29 }
 0x2fa   :  { %v1193_v31 = vpop.f32.mrb[8].mxu0 }
 0x2fb   :  { %v1194_v32 = vpop.f32.mrb[9].mxu0 }
 0x2fc   :  { %v1195_v34 = vadd.f32 %v1194_v32, %v1193_v31  ;;  %v1196_v35 = vpop.f32.mrb[10].mxu0 }
 0x2fd   :  { %v1197_v36 = vpop.f32.mrb[11].mxu0 }
 0x2fe   :  { %v1198_v37 = vadd.f32 %v1197_v36, %v1196_v35  ;;  %v974_v38 = vadd.f32 %v1195_v34, %v1092_v33 }
 0x300   :  { %v981_v39 = vsel %vm980_vm2, %v974_v38, -inf  ;;  %v977_v40 = vadd.f32 %v1198_v37, %v1092_v33 }
 0x301   :  { %982 = vmax.xlane.f32.xlu0 %v981_v39 }
 0x302   :  { %v984_v41 = vsel %vm980_vm2, %v977_v40, -inf }
 0x305   :  { %985 = vmax.xlane.f32.xlu0 %v984_v41 }
 0x38e   :  { %v983_v42 = vpop.xlane.xlu0 %982 }
 0x38f   :  { %v987_v43 = vsub.f32 %v974_v38, %v983_v42 }
 0x391   :  { %v989_v44 = vmul.f32 1.442695, %v987_v43 }
 0x392   :  { %v986_v45 = vpop.xlane.xlu0 %985 }
 0x393   :  { %1306 = vpow2.f32 %v989_v44  ;;  %v988_v46 = vsub.f32 %v977_v40, %v986_v45 }
 0x395   :  { %v991_v47 = vmul.f32 1.442695, %v988_v46 }
 0x397   :  { %1308 = vpow2.f32 %v991_v47 }
 0x39d   :  { %v1307_v48 = vpop.eup %1306 }
 0x39e   :  { %v993_v49 = vsel %vm980_vm2, %v1307_v48, 0.0 }
 0x39f   :  { %994 = vadd.xlane.f32.xlu1 %v993_v49 }
 0x3a1   :  { %v1309_v50 = vpop.eup %1308 }
 0x3a2   :  { %v996_v51 = vsel %vm980_vm2, %v1309_v50, 0.0 }
 0x3a3   :  { %997 = vadd.xlane.f32.xlu1 %v996_v51 }
 0x42c   :  { %v995_v52 = vpop.xlane.xlu1 %994 }
 0x42d   :  { %1310 = vlog2.f32 %v995_v52 }
 0x430   :  { %v998_v53 = vpop.xlane.xlu1 %997 }
 0x431   :  { %1312 = vlog2.f32 %v998_v53 }
 0x437   :  { %v1311_v54 = vpop.eup %1310 }
 0x438   :  { %v1000_v55 = vmul.f32 0.6931472, %v1311_v54 }
 0x43a   :  { %v1003_v56 = vsub.f32 %v987_v43, %v1000_v55 }
 0x43b   :  { %v1313_v57 = vpop.eup %1312 }
 0x43c   :  { %1005 = vst.msk [vmem:[#allocation7] sm:$0xff] %vm980_vm2, %v1003_v56  ;;  %v1002_v58 = vmul.f32 0.6931472, %v1313_v57 }
 0x43e   :  { %v1004_v59 = vsub.f32 %v988_v46, %v1002_v58 }
 0x440   :  { %1006 = vst.msk [vmem:[#allocation7 + $0x8] sm:$0xff] %vm980_vm2, %v1004_v59 }
 0x441   :  { %1369 = shalt.err (!%p1366_p6)
}
 0x442   :  { %s1370_s23 = scalar_lea.hbm %s1592_s7, 256 }
 0x443   :  { %p1371_p7 = scmp.ne.s32.totalorder %s1592_s7, %s1370_s23  ;;  %p1374_p8 = scmp.lt.u32.totalorder %s1370_s23, %s1592_s7 }
 0x445   :  { %p1376_p9 = pnand %p1374_p8, %p1371_p7 }
 0x447   :  { %1379 = shalt.err (!%p1376_p9)
}
 0x448   :  { %s1396_s27 = smov 128   ;;  %s1397_s1 = smov 8  }
 0x449   :  { %1018 = dma.vmem_to_hbm [thread:$0]  %s1013_s19, 256, %s1592_s7, [#allocation4], %s1396_s27, %s1396_s27, %s1397_s1  }
 0x44a   :  { %1384 = dma.done.wait [#allocation4], 256  }
 0x44b   :  { %1385 = vsyncadd [#allocation4], 4294967040 }
 0x44c   :  { %1022 = vsyncpa [#allocation3], 1 }
 0x44d   :  { %1023 = vsyncpa [#allocation6], 1 }
 0x44e   :  { %1024 = vsyncpa [#allocation4], 1 }

</bundles_post_ra>
